<compile_context>
chip_gen: v7x
topology: tpu7x:2x2x1
jax: 0.10.0
libtpu: 0.0.40
codegen_flags: <defaults>
</compile_context>

<pallas_src>
import jax
import jax.numpy as jnp
import numpy as np
from jax import lax
from jax.experimental import pallas as pl
from jax.experimental.pallas import tpu as pltpu


# ---------------------------------------------------------------------------
# Kernel 1: hoisted input->state conv, fully parallel over all (b, s, w) rows.
# MaskedConv1d('B', k=3) zeroes its 3rd tap, so only taps {x[w-1], x[w]} remain
# -> a single (rows, 2C) @ (2C, 4H) GEMM with (bi + bs) folded in.
# ---------------------------------------------------------------------------
def _input_conv_kernel(xop_ref, w_ref, b_ref, o_ref):
    acc = jnp.dot(xop_ref[...], w_ref[...], preferred_element_type=jnp.float32)
    o_ref[...] = (acc + b_ref[...]).astype(o_ref.dtype)


# ---------------------------------------------------------------------------
# Kernel 2: the recurrence.  One grid step per batch element ("parallel"), rows
# run as an in-kernel fori_loop with the whole precomputed i_s block for this
# batch element resident in VMEM.  Per row: one fused (W, 3H) @ (3H, 4H) MXU
# push for the state conv + f32 gate math.
# ---------------------------------------------------------------------------
def _row_lstm_recurrent_kernel(is_ref, ws_ref, o_ref, h_st):
    S, W, H4 = is_ref.shape
    H = H4 // 4

    # init == 'zero': zero the h state (incl. the two halo rows, which stay 0).
    h_st[...] = jnp.zeros_like(h_st)
    w_s = ws_ref[...]                                    # (3H, 4H), loop invariant

    def step(s, c_prev):                                 # c_prev: (W, H) f32
        h_halo = h_st[...]                               # (W+2, H) f32
        # fused 3-tap operand [h[w-1] | h[w] | h[w+1]] from static halo views.
        op = jnp.concatenate(
            [h_halo[0:W, :], h_halo[1:W + 1, :], h_halo[2:W + 2, :]], axis=-1)
        s_s = jnp.dot(op.astype(w_s.dtype), w_s,
                      preferred_element_type=jnp.float32)          # (W, 4H)
        gates = jax.nn.sigmoid(is_ref[s].astype(jnp.float32) + s_s)
        # channel-major gate split (matches torch.split over 4*H*W).
        # NOTE: with H < 128 these are sub-lane-group slices; production sizes
        # should pick H as a multiple of 128 (or pad per-gate lanes) so they are
        # free static views and the output store is lane-dense.
        i_g = gates[:, 0 * H:1 * H]
        g_g = gates[:, 1 * H:2 * H]
        f_g = gates[:, 2 * H:3 * H]
        o_g = gates[:, 3 * H:4 * H]
        c_new = f_g * c_prev + i_g * g_g
        h_new = o_g * jnp.tanh(c_new)
        h_st[pl.ds(1, W), :] = h_new                     # interior only; halos stay 0
        o_ref[pl.ds(s, 1), :, :] = h_new[None].astype(o_ref.dtype)
        return c_new

    # S (number of image rows) is a small static trip count -> unroll for LLO
    # scheduling visibility across iterations.
    lax.fori_loop(0, S, step, jnp.zeros((W, H), jnp.float32), unroll=True)


def row_lstm_forward(x_nchw, wi, ws, bi, bs, hidden_dims,
                     operand_dtype=jnp.bfloat16):
    """RowLSTM forward.

    x_nchw: (B, C, S, W) f32; wi/ws: (4H, C, 3) torch Conv1d weights; bi/bs: (4H,).
    `operand_dtype` is used for the MXU matmul operands and the streamed i_s
    activations (bf16 = production fast path); state, accumulation and gate math
    always stay float32.
    """
    B, C, S, W = x_nchw.shape
    H = hidden_dims
    assert C == H, "original PyTorch forward requires channel_in == hidden_dims"
    H4 = 4 * H

    # ---- host-side weight prep -------------------------------------------
    # torch Conv1d (pad=1): out[w] = sum_k W[:, :, k] @ x[w + k - 1]
    # masked conv 'B' (k=3) zeroes tap k=2 -> drop it (dead matmul otherwise).
    wi2 = jnp.concatenate([wi[:, :, 0].T, wi[:, :, 1].T], axis=0)           # (2C, 4H)
    ws3 = jnp.concatenate([ws[:, :, 0].T, ws[:, :, 1].T, ws[:, :, 2].T],
                          axis=0)                                            # (3H, 4H)
    bias = (bi + bs).reshape(1, H4).astype(jnp.float32)
    wi2 = wi2.astype(operand_dtype)
    ws3 = ws3.astype(operand_dtype)

    # ---- stage 1: hoisted, fully parallel input->state conv ----------------
    x_bswc = jnp.transpose(x_nchw, (0, 2, 3, 1))                             # (B,S,W,C)
    x_prev = jnp.pad(x_bswc, ((0, 0), (0, 0), (1, 0), (0, 0)))[:, :, :W, :]  # x[w-1]
    x_op = jnp.concatenate([x_prev, x_bswc], axis=-1).astype(operand_dtype)  # (B,S,W,2C)

    R = B * S * W
    rb = R if R <= 1024 else 512                # row block (mult. of 8 / full extent)
    r_pad = ((R + rb - 1) // rb) * rb
    x_flat = x_op.reshape(R, 2 * C)
    if r_pad != R:
        x_flat = jnp.pad(x_flat, ((0, r_pad - R), (0, 0)))

    i_s_flat = pl.pallas_call(
        _input_conv_kernel,
        out_shape=jax.ShapeDtypeStruct((r_pad, H4), operand_dtype),
        grid_spec=pltpu.PrefetchScalarGridSpec(
            num_scalar_prefetch=0,
            grid=(r_pad // rb,),
            in_specs=[
                pl.BlockSpec((rb, 2 * C), lambda r: (r, 0)),
                pl.BlockSpec((2 * C, H4), lambda r: (0, 0)),
                pl.BlockSpec((1, H4), lambda r: (0, 0)),
            ],
            out_specs=pl.BlockSpec((rb, H4), lambda r: (r, 0)),
        ),
        compiler_params=pltpu.CompilerParams(dimension_semantics=("parallel",)),
    )(x_flat, wi2, bias)
    i_s = i_s_flat[:R].reshape(B, S, W, H4)

    # ---- stage 2: the recurrence over rows ---------------------------------
    # Per-batch-element VMEM ~= 2*(S*W*4H*itemsize + S*W*H*4) + 3H*4H + (W+2)*H*4:
    # tiny here.  For production B/W/H re-derive against v7x's 64 MiB VMEM and set
    # pltpu.CompilerParams(vmem_limit_bytes=...) explicitly / shrink S per block.
    h_steps = pl.pallas_call(
        _row_lstm_recurrent_kernel,
        out_shape=jax.ShapeDtypeStruct((B, S, W, H), jnp.float32),
        grid_spec=pltpu.PrefetchScalarGridSpec(
            num_scalar_prefetch=0,
            grid=(B,),
            in_specs=[
                pl.BlockSpec((None, S, W, H4), lambda b: (b, 0, 0, 0)),
                pl.BlockSpec((3 * H, H4), lambda b: (0, 0)),
            ],
            out_specs=pl.BlockSpec((None, S, W, H), lambda b: (b, 0, 0, 0)),
            scratch_shapes=[pltpu.VMEM((W + 2, H), jnp.float32)],   # halo-padded h
        ),
        compiler_params=pltpu.CompilerParams(dimension_semantics=("parallel",)),
    )(i_s, ws3)

    # ---- reassemble exactly like the torch code (layout plumbing in XLA) ----
    # per-step h is (B, hidden*width) hidden-major, cat over seq, then the quirky
    # .view(-1, S, W, H) reinterpretation and .permute(0, 3, 1, 2).
    h_bshw = jnp.transpose(h_steps, (0, 1, 3, 2))            # (B, S, H, W)
    flat = h_bshw.reshape(B, S, H * W)                       # hidden-major flatten
    out = flat.reshape(B, S, W, H).transpose(0, 3, 1, 2)     # quirky view + permute
    return out


def row_lstm_reference(x_nchw, wi, ws, bi, bs, hidden_dims):
    """Plain-JAX reference mirroring the PyTorch forward, for verification."""
    B, C, S, W = x_nchw.shape
    H = hidden_dims
    wi_m = wi.at[:, :, 2].set(0.0)

    def conv1d(v_bcw, w, b):  # v: (B, Cin, W), w: (Cout, Cin, 3), pad=1
        vp = jnp.pad(v_bcw, ((0, 0), (0, 0), (1, 1)))
        out = jnp.zeros((B, w.shape[0], W), jnp.float32)
        for k in range(3):
            out = out + jnp.einsum('oi,biw->bow', w[:, :, k], vp[:, :, k:k + W])
        return out + b[None, :, None]

    nu = H * W
    c = jnp.zeros((B, nu), jnp.float32)
    h = jnp.zeros((B, nu), jnp.float32)
    steps = []
    for s in range(S):
        x_row = x_nchw[:, :, s, :].astype(jnp.float32)
        h_img = h.reshape(B, H, W)
        s_s = conv1d(h_img, ws, bs).reshape(B, 4 * nu)
        i_s = conv1d(x_row, wi_m, bi).reshape(B, 4 * nu)
        g = jax.nn.sigmoid(s_s + i_s)
        i_, gg, f_, o_ = g[:, :nu], g[:, nu:2 * nu], g[:, 2 * nu:3 * nu], g[:, 3 * nu:]
        c = f_ * c + i_ * gg
        h = o_ * jnp.tanh(c)
        steps.append(h[:, None, :])
    stacked = jnp.concatenate(steps, axis=1)                 # (B, S, H*W)
    return stacked.reshape(B, S, W, H).transpose(0, 3, 1, 2)


if __name__ == "__main__":
    # small shapes consistent with the module (torch forward requires C == H)
    batch, channel_in, n_seq, width = 2, 8, 8, 32
    hidden_dims = channel_in

    key = jax.random.PRNGKey(0)
    kx, kwi, kws, kbi, kbs = jax.random.split(key, 5)

    x = jax.random.normal(kx, (batch, channel_in, n_seq, width), dtype=jnp.float32)
    wi = 0.1 * jax.random.normal(kwi, (4 * hidden_dims, channel_in, 3), dtype=jnp.float32)
    ws = 0.1 * jax.random.normal(kws, (4 * hidden_dims, channel_in, 3), dtype=jnp.float32)
    bi = 0.1 * jax.random.normal(kbi, (4 * hidden_dims,), dtype=jnp.float32)
    bs = 0.1 * jax.random.normal(kbs, (4 * hidden_dims,), dtype=jnp.float32)

    ref = jax.block_until_ready(row_lstm_reference(x, wi, ws, bi, bs, hidden_dims))

    # strict numerics check with f32 matmul operands
    out_f32 = jax.block_until_ready(
        row_lstm_forward(x, wi, ws, bi, bs, hidden_dims, operand_dtype=jnp.float32))
    assert out_f32.shape == (batch, hidden_dims, n_seq, width), out_f32.shape
    np.testing.assert_allclose(np.asarray(out_f32), np.asarray(ref), rtol=1e-4, atol=1e-4)

    # production fast path: bf16 matmul operands / i_s stream, f32 state & gates.
    # Loose tolerance: bf16 operand rounding through the 8-step recurrence
    # (typical max error ~1e-2).
    out_bf16 = jax.block_until_ready(
        row_lstm_forward(x, wi, ws, bi, bs, hidden_dims, operand_dtype=jnp.bfloat16))
    np.testing.assert_allclose(np.asarray(out_bf16), np.asarray(ref), rtol=1e-1, atol=1e-1)

    # TODO(synk): init modes 'noise'/'variable'/'variable noise' (random/learned
    # initial states) are not exercised; only the default init='zero' path exists.
    print("KERNEL_OK")
</pallas_src>

<mosaic_0001>
module attributes {stable_mosaic.version = 11 : i64} {
  func.func @_input_conv_kernel(%arg0: i32, %arg1: memref<512x16xf32, #tpu.memory_space<vmem>>, %arg2: memref<16x32xf32, #tpu.memory_space<vmem>>, %arg3: memref<1x32xf32, #tpu.memory_space<vmem>>, %arg4: memref<512x32xf32, #tpu.memory_space<vmem>>) attributes {dimension_semantics = [#tpu.dimension_semantics<parallel>], iteration_bounds = array<i64: 1>, scalar_prefetch = 0 : i64, scratch_operands = 0 : i64, tpu.core_type = #tpu.core_type<tc>, window_params = [{transform_indices = @transform_0, window_bounds = array<i64: 512, 16>}, {pipeline_mode = #tpu.pipeline_mode<synchronous>, transform_indices = @transform_1, window_bounds = array<i64: 16, 32>}, {pipeline_mode = #tpu.pipeline_mode<synchronous>, transform_indices = @transform_2, window_bounds = array<i64: 1, 32>}, {transform_indices = @transform_3, window_bounds = array<i64: 512, 32>}]} {
    %c0 = arith.constant 0 : index
    %c0_0 = arith.constant 0 : index
    %0 = vector.load %arg1[%c0, %c0_0] : memref<512x16xf32, #tpu.memory_space<vmem>>, vector<512x16xf32>
    %c0_1 = arith.constant 0 : index
    %c0_2 = arith.constant 0 : index
    %1 = vector.load %arg2[%c0_1, %c0_2] : memref<16x32xf32, #tpu.memory_space<vmem>>, vector<16x32xf32>
    %cst = arith.constant dense<0.000000e+00> : vector<512x32xf32>
    %2 = tpu.matmul %0, %1, %cst {dimension_numbers = #tpu.dot_dimension_numbers<[1], [0], [0], [1], [0, 0, 1, 1], [], []>} : vector<512x16xf32>, vector<16x32xf32>, vector<512x32xf32> -> vector<512x32xf32>
    %c0_3 = arith.constant 0 : index
    %c0_4 = arith.constant 0 : index
    %3 = vector.load %arg3[%c0_3, %c0_4] : memref<1x32xf32, #tpu.memory_space<vmem>>, vector<1x32xf32>
    %4 = vector.broadcast %3 : vector<1x32xf32> to vector<512x32xf32>
    %5 = arith.addf %2, %4 : vector<512x32xf32>
    %c0_5 = arith.constant 0 : index
    %c0_6 = arith.constant 0 : index
    %6 = vector.load %arg4[%c0_5, %c0_6] : memref<512x32xf32, #tpu.memory_space<vmem>>, vector<512x32xf32>
    tpu.vector_store %arg4[%c0_5, %c0_6], %5 {strides = array<i32>} : memref<512x32xf32, #tpu.memory_space<vmem>>, vector<512x32xf32>,
    return
  }
  func.func @transform_0(%arg0: i32) -> (i32, i32) {
    %c0_i32 = arith.constant 0 : i32
    %c0_i32_0 = arith.constant 0 : i32
    return %arg0, %c0_i32 : i32, i32
  }
  func.func @transform_1(%arg0: i32) -> (i32, i32) {
    %c0_i32 = arith.constant 0 : i32
    %c0_i32_0 = arith.constant 0 : i32
    %c0_i32_1 = arith.constant 0 : i32
    return %c0_i32, %c0_i32_0 : i32, i32
  }
  func.func @transform_2(%arg0: i32) -> (i32, i32) {
    %c0_i32 = arith.constant 0 : i32
    %c0_i32_0 = arith.constant 0 : i32
    %c0_i32_1 = arith.constant 0 : i32
    return %c0_i32, %c0_i32_0 : i32, i32
  }
  func.func @transform_3(%arg0: i32) -> (i32, i32) {
    %c0_i32 = arith.constant 0 : i32
    %c0_i32_0 = arith.constant 0 : i32
    return %arg0, %c0_i32 : i32, i32
  }
}

</mosaic_0001>

<bundles_post_ra>
// kernel: tpu_custom_call.1
= control target key start
LH: loop header
LB: loop body
LE: loop exit
PB: predicated region body
PF: predicated region fallthrough
CT: control target
= control target key end

     0   :  { %vm87_vm0 = vcmask 130048   ;;  %vm665_vm1 = vcmask 261120   ;;  %s1578_s1 = inlined_call_operand.vmem [shape: f32[16,32], index: 1, kind: input, shape index: {}]   ;;  %s1579_s0 = inlined_call_operand.vmem [shape: f32[512,16], index: 0, kind: input, shape index: {}]   ;;  %s1580_s2 = inlined_call_operand.vmem [shape: f32[1,32], index: 2, kind: input, shape index: {}]   ;;  %s1581_s3 = inlined_call_operand.vmem [shape: f32[512,32], index: 3, kind: output, shape index: {}]  }
   0x1   :  { %v78_v0 = vld [vmem:[%s1578_s1] sm:$0xff]  ;;  %v79_v1 = vld [vmem:[%s1578_s1 + $0x8] sm:$0xff]  ;;  %v16_v7 = vld [vmem:[%s1579_s0 + $0x10] sm:$0xff] }
   0x2   :  { %v14_v2 = vld [vmem:[%s1579_s0] sm:$0xff]  ;;  %v965_v3 = vpack.c.bf16 %v79_v1, %v78_v0  ;;  %v15_v5 = vld [vmem:[%s1579_s0 + $0x8] sm:$0xff]  ;;  %v48_v8 = vld [vmem:[%s1579_s0 + $0x110] sm:$0xff] }
   0x3   :  { %869 = vmatprep.mubr.msk.f32.mxu0 %vm87_vm0, %v14_v2  ;;  %v46_v4 = vld [vmem:[%s1579_s0 + $0x100] sm:$0xff]  ;;  %v47_v6 = vld [vmem:[%s1579_s0 + $0x108] sm:$0xff]  ;;  %v17_v9 = vld [vmem:[%s1579_s0 + $0x18] sm:$0xff] }
   0x4   :  { %917 = vmatprep.mubr.msk.f32.mxu1 %vm87_vm0, %v46_v4  ;;  %966 = vmatprep.subr.bf16.mxu0 %v965_v3  ;;  %v49_v10 = vld [vmem:[%s1579_s0 + $0x118] sm:$0xff]  ;;  %v18_v11 = vld [vmem:[%s1579_s0 + $0x20] sm:$0xff]  ;;  %v19_v13 = vld [vmem:[%s1579_s0 + $0x28] sm:$0xff] }
   0x5   :  { %969 = vmatprep.subr.bf16.mxu1 %v965_v3  ;;  %968 = vmatpush3.bf16.msra.mxu0 %v965_v3  ;;  %v50_v12 = vld [vmem:[%s1579_s0 + $0x120] sm:$0xff]  ;;  %v51_v14 = vld [vmem:[%s1579_s0 + $0x128] sm:$0xff]  ;;  %v20_v15 = vld [vmem:[%s1579_s0 + $0x30] sm:$0xff] }
   0x6   :  { %970 = vmatpush3.bf16.msra.mxu1 %v965_v3  ;;  %v52_v16 = vld [vmem:[%s1579_s0 + $0x130] sm:$0xff]  ;;  %v21_v17 = vld [vmem:[%s1579_s0 + $0x38] sm:$0xff]  ;;  %v22_v19 = vld [vmem:[%s1579_s0 + $0x40] sm:$0xff] }
   0x7   :  { %v53_v18 = vld [vmem:[%s1579_s0 + $0x138] sm:$0xff]  ;;  %v54_v20 = vld [vmem:[%s1579_s0 + $0x140] sm:$0xff]  ;;  %v23_v21 = vld [vmem:[%s1579_s0 + $0x48] sm:$0xff] }
   0x8   :  { %870 = vmatmul.mubr.msk.f32.vlgmr.msra.gmra.mrb[0].mxu0 %vm87_vm0, %v15_v5  ;;  %v55_v22 = vld [vmem:[%s1579_s0 + $0x148] sm:$0xff]  ;;  %v24_v23 = vld [vmem:[%s1579_s0 + $0x50] sm:$0xff]  ;;  %v25_v25 = vld [vmem:[%s1579_s0 + $0x58] sm:$0xff] }
   0x9   :  { %918 = vmatmul.mubr.msk.f32.vlgmr.msra.gmra.mrb[0].mxu1 %vm87_vm0, %v47_v6  ;;  %872 = vmatprep.mubr.msk.f32.mxu0 %vm87_vm0, %v16_v7  ;;  %v56_v24 = vld [vmem:[%s1579_s0 + $0x150] sm:$0xff]  ;;  %v57_v26 = vld [vmem:[%s1579_s0 + $0x158] sm:$0xff]  ;;  %v26_v27 = vld [vmem:[%s1579_s0 + $0x60] sm:$0xff] }
   0xa   :  { %920 = vmatprep.mubr.msk.f32.mxu1 %vm87_vm0, %v48_v8  ;;  %v58_v28 = vld [vmem:[%s1579_s0 + $0x160] sm:$0xff]  ;;  %v27_v29 = vld [vmem:[%s1579_s0 + $0x68] sm:$0xff]  ;;  %v28_v31 = vld [vmem:[%s1579_s0 + $0x70] sm:$0xff] }
   0xb   :  { %v59_v30 = vld [vmem:[%s1579_s0 + $0x168] sm:$0xff]  ;;  %v60_v32 = vld [vmem:[%s1579_s0 + $0x170] sm:$0xff]  ;;  %v29_v33 = vld [vmem:[%s1579_s0 + $0x78] sm:$0xff] }
   0xc   :  { %873 = vmatmul.mubr.msk.f32.gmra.mrb[2].mxu0 %vm87_vm0, %v17_v9  ;;  %v61_v34 = vld [vmem:[%s1579_s0 + $0x178] sm:$0xff]  ;;  %v30_v35 = vld [vmem:[%s1579_s0 + $0x80] sm:$0xff]  ;;  %v31_v37 = vld [vmem:[%s1579_s0 + $0x88] sm:$0xff] }
   0xd   :  { %921 = vmatmul.mubr.msk.f32.gmra.mrb[2].mxu1 %vm87_vm0, %v49_v10  ;;  %875 = vmatprep.mubr.msk.f32.mxu0 %vm87_vm0, %v18_v11  ;;  %v62_v36 = vld [vmem:[%s1579_s0 + $0x180] sm:$0xff]  ;;  %v63_v38 = vld [vmem:[%s1579_s0 + $0x188] sm:$0xff]  ;;  %v32_v39 = vld [vmem:[%s1579_s0 + $0x90] sm:$0xff] }
   0xe   :  { %923 = vmatprep.mubr.msk.f32.mxu1 %vm87_vm0, %v50_v12  ;;  %v64_v40 = vld [vmem:[%s1579_s0 + $0x190] sm:$0xff]  ;;  %v33_v41 = vld [vmem:[%s1579_s0 + $0x98] sm:$0xff]  ;;  %v34_v43 = vld [vmem:[%s1579_s0 + $0xa0] sm:$0xff] }
   0xf   :  { %v65_v42 = vld [vmem:[%s1579_s0 + $0x198] sm:$0xff]  ;;  %v66_v44 = vld [vmem:[%s1579_s0 + $0x1a0] sm:$0xff]  ;;  %v35_v45 = vld [vmem:[%s1579_s0 + $0xa8] sm:$0xff] }
  0x10   :  { %876 = vmatmul.mubr.msk.f32.gmra.mrb[4].mxu0 %vm87_vm0, %v19_v13  ;;  %v67_v46 = vld [vmem:[%s1579_s0 + $0x1a8] sm:$0xff]  ;;  %v36_v47 = vld [vmem:[%s1579_s0 + $0xb0] sm:$0xff]  ;;  %v37_v49 = vld [vmem:[%s1579_s0 + $0xb8] sm:$0xff] }
  0x11   :  { %924 = vmatmul.mubr.msk.f32.gmra.mrb[4].mxu1 %vm87_vm0, %v51_v14  ;;  %878 = vmatprep.mubr.msk.f32.mxu0 %vm87_vm0, %v20_v15  ;;  %v68_v48 = vld [vmem:[%s1579_s0 + $0x1b0] sm:$0xff]  ;;  %v69_v50 = vld [vmem:[%s1579_s0 + $0x1b8] sm:$0xff]  ;;  %v38_v51 = vld [vmem:[%s1579_s0 + $0xc0] sm:$0xff] }
  0x12   :  { %926 = vmatprep.mubr.msk.f32.mxu1 %vm87_vm0, %v52_v16  ;;  %v70_v52 = vld [vmem:[%s1579_s0 + $0x1c0] sm:$0xff]  ;;  %v39_v53 = vld [vmem:[%s1579_s0 + $0xc8] sm:$0xff]  ;;  %v40_v55 = vld [vmem:[%s1579_s0 + $0xd0] sm:$0xff] }
  0x13   :  { %v71_v54 = vld [vmem:[%s1579_s0 + $0x1c8] sm:$0xff]  ;;  %v72_v56 = vld [vmem:[%s1579_s0 + $0x1d0] sm:$0xff]  ;;  %v41_v57 = vld [vmem:[%s1579_s0 + $0xd8] sm:$0xff] }
  0x14   :  { %879 = vmatmul.mubr.msk.f32.gmra.mrb[6].mxu0 %vm87_vm0, %v21_v17  ;;  %v73_v58 = vld [vmem:[%s1579_s0 + $0x1d8] sm:$0xff]  ;;  %v42_v59 = vld [vmem:[%s1579_s0 + $0xe0] sm:$0xff]  ;;  %v43_v61 = vld [vmem:[%s1579_s0 + $0xe8] sm:$0xff] }
  0x15   :  { %927 = vmatmul.mubr.msk.f32.gmra.mrb[6].mxu1 %vm87_vm0, %v53_v18  ;;  %881 = vmatprep.mubr.msk.f32.mxu0 %vm87_vm0, %v22_v19  ;;  %v74_v60 = vld [vmem:[%s1579_s0 + $0x1e0] sm:$0xff]  ;;  %v75_v62 = vld [vmem:[%s1579_s0 + $0x1e8] sm:$0xff]  ;;  %v44_v63 = vld [vmem:[%s1579_s0 + $0xf0] sm:$0xff] }
  0x16   :  { %929 = vmatprep.mubr.msk.f32.mxu1 %vm87_vm0, %v54_v20  ;;  %v76_v0 = vld [vmem:[%s1579_s0 + $0x1f0] sm:$0xff]  ;;  %v45_v1 = vld [vmem:[%s1579_s0 + $0xf8] sm:$0xff]  ;;  %v1256_v3 = vld [vmem:[%s1580_s2] ss:$0 sm:$0xff] }
  0x17   :  { %v77_v2 = vld [vmem:[%s1579_s0 + $0x1f8] sm:$0xff] }
  0x18   :  { %882 = vmatmul.mubr.msk.f32.gmra.mrb[8].mxu0 %vm87_vm0, %v23_v21 }
  0x19   :  { %930 = vmatmul.mubr.msk.f32.gmra.mrb[8].mxu1 %vm87_vm0, %v55_v22  ;;  %884 = vmatprep.mubr.msk.f32.mxu0 %vm87_vm0, %v24_v23 }
  0x1a   :  { %932 = vmatprep.mubr.msk.f32.mxu1 %vm87_vm0, %v56_v24 }
  0x1c   :  { %885 = vmatmul.mubr.msk.f32.gmra.mrb[10].mxu0 %vm87_vm0, %v25_v25 }
  0x1d   :  { %933 = vmatmul.mubr.msk.f32.gmra.mrb[10].mxu1 %vm87_vm0, %v57_v26  ;;  %887 = vmatprep.mubr.msk.f32.mxu0 %vm87_vm0, %v26_v27 }
  0x1e   :  { %935 = vmatprep.mubr.msk.f32.mxu1 %vm87_vm0, %v58_v28 }
  0x20   :  { %888 = vmatmul.mubr.msk.f32.gmra.mrb[12].mxu0 %vm87_vm0, %v27_v29 }
  0x21   :  { %936 = vmatmul.mubr.msk.f32.gmra.mrb[12].mxu1 %vm87_vm0, %v59_v30  ;;  %890 = vmatprep.mubr.msk.f32.mxu0 %vm87_vm0, %v28_v31 }
  0x22   :  { %938 = vmatprep.mubr.msk.f32.mxu1 %vm87_vm0, %v60_v32 }
  0x24   :  { %891 = vmatmul.mubr.msk.f32.gmra.mrb[14].mxu0 %vm87_vm0, %v29_v33 }
  0x25   :  { %939 = vmatmul.mubr.msk.f32.gmra.mrb[14].mxu1 %vm87_vm0, %v61_v34  ;;  %893 = vmatprep.mubr.msk.f32.mxu0 %vm87_vm0, %v30_v35 }
  0x26   :  { %941 = vmatprep.mubr.msk.f32.mxu1 %vm87_vm0, %v62_v36 }
  0x28   :  { %894 = vmatmul.mubr.msk.f32.gmra.mrb[16].mxu0 %vm87_vm0, %v31_v37 }
  0x29   :  { %942 = vmatmul.mubr.msk.f32.gmra.mrb[16].mxu1 %vm87_vm0, %v63_v38  ;;  %896 = vmatprep.mubr.msk.f32.mxu0 %vm87_vm0, %v32_v39 }
  0x2a   :  { %944 = vmatprep.mubr.msk.f32.mxu1 %vm87_vm0, %v64_v40 }
  0x2c   :  { %897 = vmatmul.mubr.msk.f32.gmra.mrb[18].mxu0 %vm87_vm0, %v33_v41 }
  0x2d   :  { %945 = vmatmul.mubr.msk.f32.gmra.mrb[18].mxu1 %vm87_vm0, %v65_v42  ;;  %899 = vmatprep.mubr.msk.f32.mxu0 %vm87_vm0, %v34_v43 }
  0x2e   :  { %947 = vmatprep.mubr.msk.f32.mxu1 %vm87_vm0, %v66_v44 }
  0x30   :  { %900 = vmatmul.mubr.msk.f32.gmra.mrb[20].mxu0 %vm87_vm0, %v35_v45 }
  0x31   :  { %948 = vmatmul.mubr.msk.f32.gmra.mrb[20].mxu1 %vm87_vm0, %v67_v46  ;;  %902 = vmatprep.mubr.msk.f32.mxu0 %vm87_vm0, %v36_v47 }
  0x32   :  { %950 = vmatprep.mubr.msk.f32.mxu1 %vm87_vm0, %v68_v48 }
  0x34   :  { %903 = vmatmul.mubr.msk.f32.gmra.mrb[22].mxu0 %vm87_vm0, %v37_v49 }
  0x35   :  { %951 = vmatmul.mubr.msk.f32.gmra.mrb[22].mxu1 %vm87_vm0, %v69_v50  ;;  %905 = vmatprep.mubr.msk.f32.mxu0 %vm87_vm0, %v38_v51 }
  0x36   :  { %953 = vmatprep.mubr.msk.f32.mxu1 %vm87_vm0, %v70_v52 }
  0x38   :  { %906 = vmatmul.mubr.msk.f32.gmra.mrb[24].mxu0 %vm87_vm0, %v39_v53 }
  0x39   :  { %954 = vmatmul.mubr.msk.f32.gmra.mrb[24].mxu1 %vm87_vm0, %v71_v54  ;;  %908 = vmatprep.mubr.msk.f32.mxu0 %vm87_vm0, %v40_v55 }
  0x3a   :  { %956 = vmatprep.mubr.msk.f32.mxu1 %vm87_vm0, %v72_v56 }
  0x3c   :  { %909 = vmatmul.mubr.msk.f32.gmra.mrb[26].mxu0 %vm87_vm0, %v41_v57 }
  0x3d   :  { %957 = vmatmul.mubr.msk.f32.gmra.mrb[26].mxu1 %vm87_vm0, %v73_v58  ;;  %911 = vmatprep.mubr.msk.f32.mxu0 %vm87_vm0, %v42_v59 }
  0x3e   :  { %959 = vmatprep.mubr.msk.f32.mxu1 %vm87_vm0, %v74_v60 }
  0x40   :  { %912 = vmatmul.mubr.msk.f32.gmra.mrb[28].mxu0 %vm87_vm0, %v43_v61 }
  0x41   :  { %960 = vmatmul.mubr.msk.f32.gmra.mrb[28].mxu1 %vm87_vm0, %v75_v62  ;;  %914 = vmatprep.mubr.msk.f32.mxu0 %vm87_vm0, %v44_v63 }
  0x42   :  { %962 = vmatprep.mubr.msk.f32.mxu1 %vm87_vm0, %v76_v0 }
  0x44   :  { %915 = vmatmul.mubr.msk.f32.gmra.mrb[30].mxu0 %vm87_vm0, %v45_v1 }
  0x45   :  { %963 = vmatmul.mubr.msk.f32.gmra.mrb[30].mxu1 %vm87_vm0, %v77_v2 }
  0xdb   :  { %v871_v4 = vpop.f32.mrb[0].mxu0 }
  0xdc   :  { %v919_v5 = vpop.f32.mrb[0].mxu1  ;;  %v352_v6 = vadd.f32 %v871_v4, %v1256_v3  ;;  %v346_v8 = vpop.f32.mrb[1].mxu0 }
  0xdd   :  { %v512_v7 = vadd.f32 %v919_v5, %v1256_v3  ;;  %v506_v9 = vpop.f32.mrb[1].mxu1  ;;  %v347_v10 = vadd.f32 %v1256_v3, %v346_v8 }
  0xde   :  { %v507_v11 = vadd.f32 %v1256_v3, %v506_v9  ;;  %667 = vst.msk [vmem:[%s1581_s3 + $0x8] sm:$0xff] %vm665_vm1, %v352_v6 }
  0xdf   :  { %699 = vst.msk [vmem:[%s1581_s3 + $0x108] sm:$0xff] %vm665_vm1, %v512_v7  ;;  %666 = vst.msk [vmem:[%s1581_s3] sm:$0xff] %vm665_vm1, %v347_v10  ;;  %v874_v12 = vpop.f32.mrb[2].mxu0 }
  0xe0   :  { %698 = vst.msk [vmem:[%s1581_s3 + $0x100] sm:$0xff] %vm665_vm1, %v507_v11  ;;  %v922_v13 = vpop.f32.mrb[2].mxu1  ;;  %v362_v14 = vadd.f32 %v874_v12, %v1256_v3  ;;  %v356_v16 = vpop.f32.mrb[3].mxu0 }
  0xe1   :  { %v522_v15 = vadd.f32 %v922_v13, %v1256_v3  ;;  %v516_v17 = vpop.f32.mrb[3].mxu1  ;;  %v357_v18 = vadd.f32 %v1256_v3, %v356_v16 }
  0xe2   :  { %v517_v19 = vadd.f32 %v1256_v3, %v516_v17  ;;  %669 = vst.msk [vmem:[%s1581_s3 + $0x18] sm:$0xff] %vm665_vm1, %v362_v14 }
  0xe3   :  { %701 = vst.msk [vmem:[%s1581_s3 + $0x118] sm:$0xff] %vm665_vm1, %v522_v15  ;;  %668 = vst.msk [vmem:[%s1581_s3 + $0x10] sm:$0xff] %vm665_vm1, %v357_v18  ;;  %v877_v20 = vpop.f32.mrb[4].mxu0 }
  0xe4   :  { %700 = vst.msk [vmem:[%s1581_s3 + $0x110] sm:$0xff] %vm665_vm1, %v517_v19  ;;  %v925_v21 = vpop.f32.mrb[4].mxu1  ;;  %v372_v22 = vadd.f32 %v877_v20, %v1256_v3  ;;  %v366_v24 = vpop.f32.mrb[5].mxu0 }
  0xe5   :  { %v532_v23 = vadd.f32 %v925_v21, %v1256_v3  ;;  %v526_v25 = vpop.f32.mrb[5].mxu1  ;;  %v367_v26 = vadd.f32 %v1256_v3, %v366_v24 }
  0xe6   :  { %v527_v27 = vadd.f32 %v1256_v3, %v526_v25  ;;  %671 = vst.msk [vmem:[%s1581_s3 + $0x28] sm:$0xff] %vm665_vm1, %v372_v22 }
  0xe7   :  { %703 = vst.msk [vmem:[%s1581_s3 + $0x128] sm:$0xff] %vm665_vm1, %v532_v23  ;;  %670 = vst.msk [vmem:[%s1581_s3 + $0x20] sm:$0xff] %vm665_vm1, %v367_v26  ;;  %v880_v28 = vpop.f32.mrb[6].mxu0 }
  0xe8   :  { %702 = vst.msk [vmem:[%s1581_s3 + $0x120] sm:$0xff] %vm665_vm1, %v527_v27  ;;  %v928_v29 = vpop.f32.mrb[6].mxu1  ;;  %v382_v30 = vadd.f32 %v880_v28, %v1256_v3  ;;  %v376_v32 = vpop.f32.mrb[7].mxu0 }
  0xe9   :  { %v542_v31 = vadd.f32 %v928_v29, %v1256_v3  ;;  %v536_v33 = vpop.f32.mrb[7].mxu1  ;;  %v377_v34 = vadd.f32 %v1256_v3, %v376_v32 }
  0xea   :  { %v537_v35 = vadd.f32 %v1256_v3, %v536_v33  ;;  %673 = vst.msk [vmem:[%s1581_s3 + $0x38] sm:$0xff] %vm665_vm1, %v382_v30 }
  0xeb   :  { %705 = vst.msk [vmem:[%s1581_s3 + $0x138] sm:$0xff] %vm665_vm1, %v542_v31  ;;  %672 = vst.msk [vmem:[%s1581_s3 + $0x30] sm:$0xff] %vm665_vm1, %v377_v34  ;;  %v883_v36 = vpop.f32.mrb[8].mxu0 }
  0xec   :  { %704 = vst.msk [vmem:[%s1581_s3 + $0x130] sm:$0xff] %vm665_vm1, %v537_v35  ;;  %v931_v37 = vpop.f32.mrb[8].mxu1  ;;  %v392_v38 = vadd.f32 %v883_v36, %v1256_v3  ;;  %v386_v40 = vpop.f32.mrb[9].mxu0 }
  0xed   :  { %v552_v39 = vadd.f32 %v931_v37, %v1256_v3  ;;  %v546_v41 = vpop.f32.mrb[9].mxu1  ;;  %v387_v42 = vadd.f32 %v1256_v3, %v386_v40 }
  0xee   :  { %v547_v43 = vadd.f32 %v1256_v3, %v546_v41  ;;  %675 = vst.msk [vmem:[%s1581_s3 + $0x48] sm:$0xff] %vm665_vm1, %v392_v38 }
  0xef   :  { %707 = vst.msk [vmem:[%s1581_s3 + $0x148] sm:$0xff] %vm665_vm1, %v552_v39  ;;  %674 = vst.msk [vmem:[%s1581_s3 + $0x40] sm:$0xff] %vm665_vm1, %v387_v42  ;;  %v886_v44 = vpop.f32.mrb[10].mxu0 }
  0xf0   :  { %706 = vst.msk [vmem:[%s1581_s3 + $0x140] sm:$0xff] %vm665_vm1, %v547_v43  ;;  %v934_v45 = vpop.f32.mrb[10].mxu1  ;;  %v402_v46 = vadd.f32 %v886_v44, %v1256_v3  ;;  %v396_v48 = vpop.f32.mrb[11].mxu0 }
  0xf1   :  { %v562_v47 = vadd.f32 %v934_v45, %v1256_v3  ;;  %v556_v49 = vpop.f32.mrb[11].mxu1  ;;  %v397_v50 = vadd.f32 %v1256_v3, %v396_v48 }
  0xf2   :  { %v557_v51 = vadd.f32 %v1256_v3, %v556_v49  ;;  %677 = vst.msk [vmem:[%s1581_s3 + $0x58] sm:$0xff] %vm665_vm1, %v402_v46 }
  0xf3   :  { %709 = vst.msk [vmem:[%s1581_s3 + $0x158] sm:$0xff] %vm665_vm1, %v562_v47  ;;  %676 = vst.msk [vmem:[%s1581_s3 + $0x50] sm:$0xff] %vm665_vm1, %v397_v50  ;;  %v889_v52 = vpop.f32.mrb[12].mxu0 }
  0xf4   :  { %708 = vst.msk [vmem:[%s1581_s3 + $0x150] sm:$0xff] %vm665_vm1, %v557_v51  ;;  %v937_v53 = vpop.f32.mrb[12].mxu1  ;;  %v412_v54 = vadd.f32 %v889_v52, %v1256_v3  ;;  %v406_v56 = vpop.f32.mrb[13].mxu0 }
  0xf5   :  { %v572_v55 = vadd.f32 %v937_v53, %v1256_v3  ;;  %v566_v57 = vpop.f32.mrb[13].mxu1  ;;  %v407_v58 = vadd.f32 %v1256_v3, %v406_v56 }
  0xf6   :  { %v567_v59 = vadd.f32 %v1256_v3, %v566_v57  ;;  %679 = vst.msk [vmem:[%s1581_s3 + $0x68] sm:$0xff] %vm665_vm1, %v412_v54 }
  0xf7   :  { %711 = vst.msk [vmem:[%s1581_s3 + $0x168] sm:$0xff] %vm665_vm1, %v572_v55  ;;  %678 = vst.msk [vmem:[%s1581_s3 + $0x60] sm:$0xff] %vm665_vm1, %v407_v58  ;;  %v892_v60 = vpop.f32.mrb[14].mxu0 }
  0xf8   :  { %710 = vst.msk [vmem:[%s1581_s3 + $0x160] sm:$0xff] %vm665_vm1, %v567_v59  ;;  %v940_v61 = vpop.f32.mrb[14].mxu1  ;;  %v422_v62 = vadd.f32 %v892_v60, %v1256_v3  ;;  %v416_v0 = vpop.f32.mrb[15].mxu0 }
  0xf9   :  { %v582_v63 = vadd.f32 %v940_v61, %v1256_v3  ;;  %v576_v1 = vpop.f32.mrb[15].mxu1  ;;  %v417_v2 = vadd.f32 %v1256_v3, %v416_v0 }
  0xfa   :  { %v577_v4 = vadd.f32 %v1256_v3, %v576_v1  ;;  %681 = vst.msk [vmem:[%s1581_s3 + $0x78] sm:$0xff] %vm665_vm1, %v422_v62 }
  0xfb   :  { %713 = vst.msk [vmem:[%s1581_s3 + $0x178] sm:$0xff] %vm665_vm1, %v582_v63  ;;  %680 = vst.msk [vmem:[%s1581_s3 + $0x70] sm:$0xff] %vm665_vm1, %v417_v2  ;;  %v895_v5 = vpop.f32.mrb[16].mxu0 }
  0xfc   :  { %712 = vst.msk [vmem:[%s1581_s3 + $0x170] sm:$0xff] %vm665_vm1, %v577_v4  ;;  %v943_v6 = vpop.f32.mrb[16].mxu1  ;;  %v432_v7 = vadd.f32 %v895_v5, %v1256_v3  ;;  %v426_v9 = vpop.f32.mrb[17].mxu0 }
  0xfd   :  { %v592_v8 = vadd.f32 %v943_v6, %v1256_v3  ;;  %v586_v10 = vpop.f32.mrb[17].mxu1  ;;  %v427_v11 = vadd.f32 %v1256_v3, %v426_v9 }
  0xfe   :  { %v587_v12 = vadd.f32 %v1256_v3, %v586_v10  ;;  %683 = vst.msk [vmem:[%s1581_s3 + $0x88] sm:$0xff] %vm665_vm1, %v432_v7 }
  0xff   :  { %715 = vst.msk [vmem:[%s1581_s3 + $0x188] sm:$0xff] %vm665_vm1, %v592_v8  ;;  %682 = vst.msk [vmem:[%s1581_s3 + $0x80] sm:$0xff] %vm665_vm1, %v427_v11  ;;  %v898_v13 = vpop.f32.mrb[18].mxu0 }
 0x100   :  { %714 = vst.msk [vmem:[%s1581_s3 + $0x180] sm:$0xff] %vm665_vm1, %v587_v12  ;;  %v946_v14 = vpop.f32.mrb[18].mxu1  ;;  %v442_v15 = vadd.f32 %v898_v13, %v1256_v3  ;;  %v436_v17 = vpop.f32.mrb[19].mxu0 }
 0x101   :  { %v602_v16 = vadd.f32 %v946_v14, %v1256_v3  ;;  %v596_v18 = vpop.f32.mrb[19].mxu1  ;;  %v437_v19 = vadd.f32 %v1256_v3, %v436_v17 }
 0x102   :  { %v597_v20 = vadd.f32 %v1256_v3, %v596_v18  ;;  %685 = vst.msk [vmem:[%s1581_s3 + $0x98] sm:$0xff] %vm665_vm1, %v442_v15 }
 0x103   :  { %717 = vst.msk [vmem:[%s1581_s3 + $0x198] sm:$0xff] %vm665_vm1, %v602_v16  ;;  %684 = vst.msk [vmem:[%s1581_s3 + $0x90] sm:$0xff] %vm665_vm1, %v437_v19  ;;  %v901_v21 = vpop.f32.mrb[20].mxu0 }
 0x104   :  { %716 = vst.msk [vmem:[%s1581_s3 + $0x190] sm:$0xff] %vm665_vm1, %v597_v20  ;;  %v949_v22 = vpop.f32.mrb[20].mxu1  ;;  %v452_v23 = vadd.f32 %v901_v21, %v1256_v3  ;;  %v446_v25 = vpop.f32.mrb[21].mxu0 }
 0x105   :  { %v612_v24 = vadd.f32 %v949_v22, %v1256_v3  ;;  %v606_v26 = vpop.f32.mrb[21].mxu1  ;;  %v447_v27 = vadd.f32 %v1256_v3, %v446_v25 }
 0x106   :  { %v607_v28 = vadd.f32 %v1256_v3, %v606_v26  ;;  %687 = vst.msk [vmem:[%s1581_s3 + $0xa8] sm:$0xff] %vm665_vm1, %v452_v23 }
 0x107   :  { %719 = vst.msk [vmem:[%s1581_s3 + $0x1a8] sm:$0xff] %vm665_vm1, %v612_v24  ;;  %686 = vst.msk [vmem:[%s1581_s3 + $0xa0] sm:$0xff] %vm665_vm1, %v447_v27  ;;  %v904_v29 = vpop.f32.mrb[22].mxu0 }
 0x108   :  { %718 = vst.msk [vmem:[%s1581_s3 + $0x1a0] sm:$0xff] %vm665_vm1, %v607_v28  ;;  %v952_v30 = vpop.f32.mrb[22].mxu1  ;;  %v462_v31 = vadd.f32 %v904_v29, %v1256_v3  ;;  %v456_v33 = vpop.f32.mrb[23].mxu0 }
 0x109   :  { %v622_v32 = vadd.f32 %v952_v30, %v1256_v3  ;;  %v616_v34 = vpop.f32.mrb[23].mxu1  ;;  %v457_v35 = vadd.f32 %v1256_v3, %v456_v33 }
 0x10a   :  { %v617_v36 = vadd.f32 %v1256_v3, %v616_v34  ;;  %689 = vst.msk [vmem:[%s1581_s3 + $0xb8] sm:$0xff] %vm665_vm1, %v462_v31 }
 0x10b   :  { %721 = vst.msk [vmem:[%s1581_s3 + $0x1b8] sm:$0xff] %vm665_vm1, %v622_v32  ;;  %688 = vst.msk [vmem:[%s1581_s3 + $0xb0] sm:$0xff] %vm665_vm1, %v457_v35  ;;  %v907_v37 = vpop.f32.mrb[24].mxu0 }
 0x10c   :  { %720 = vst.msk [vmem:[%s1581_s3 + $0x1b0] sm:$0xff] %vm665_vm1, %v617_v36  ;;  %v955_v38 = vpop.f32.mrb[24].mxu1  ;;  %v472_v39 = vadd.f32 %v907_v37, %v1256_v3  ;;  %v466_v41 = vpop.f32.mrb[25].mxu0 }
 0x10d   :  { %v632_v40 = vadd.f32 %v955_v38, %v1256_v3  ;;  %v626_v42 = vpop.f32.mrb[25].mxu1  ;;  %v467_v43 = vadd.f32 %v1256_v3, %v466_v41 }
 0x10e   :  { %v627_v44 = vadd.f32 %v1256_v3, %v626_v42  ;;  %691 = vst.msk [vmem:[%s1581_s3 + $0xc8] sm:$0xff] %vm665_vm1, %v472_v39 }
 0x10f   :  { %723 = vst.msk [vmem:[%s1581_s3 + $0x1c8] sm:$0xff] %vm665_vm1, %v632_v40  ;;  %690 = vst.msk [vmem:[%s1581_s3 + $0xc0] sm:$0xff] %vm665_vm1, %v467_v43  ;;  %v910_v45 = vpop.f32.mrb[26].mxu0 }
 0x110   :  { %722 = vst.msk [vmem:[%s1581_s3 + $0x1c0] sm:$0xff] %vm665_vm1, %v627_v44  ;;  %v958_v46 = vpop.f32.mrb[26].mxu1  ;;  %v482_v47 = vadd.f32 %v910_v45, %v1256_v3  ;;  %v476_v49 = vpop.f32.mrb[27].mxu0 }
 0x111   :  { %v642_v48 = vadd.f32 %v958_v46, %v1256_v3  ;;  %v636_v50 = vpop.f32.mrb[27].mxu1  ;;  %v477_v51 = vadd.f32 %v1256_v3, %v476_v49 }
 0x112   :  { %v637_v52 = vadd.f32 %v1256_v3, %v636_v50  ;;  %693 = vst.msk [vmem:[%s1581_s3 + $0xd8] sm:$0xff] %vm665_vm1, %v482_v47 }
 0x113   :  { %725 = vst.msk [vmem:[%s1581_s3 + $0x1d8] sm:$0xff] %vm665_vm1, %v642_v48  ;;  %692 = vst.msk [vmem:[%s1581_s3 + $0xd0] sm:$0xff] %vm665_vm1, %v477_v51  ;;  %v913_v53 = vpop.f32.mrb[28].mxu0 }
 0x114   :  { %724 = vst.msk [vmem:[%s1581_s3 + $0x1d0] sm:$0xff] %vm665_vm1, %v637_v52  ;;  %v961_v54 = vpop.f32.mrb[28].mxu1  ;;  %v492_v55 = vadd.f32 %v913_v53, %v1256_v3  ;;  %v486_v57 = vpop.f32.mrb[29].mxu0 }
 0x115   :  { %v652_v56 = vadd.f32 %v961_v54, %v1256_v3  ;;  %v646_v58 = vpop.f32.mrb[29].mxu1  ;;  %v487_v59 = vadd.f32 %v1256_v3, %v486_v57 }
 0x116   :  { %v647_v60 = vadd.f32 %v1256_v3, %v646_v58  ;;  %695 = vst.msk [vmem:[%s1581_s3 + $0xe8] sm:$0xff] %vm665_vm1, %v492_v55 }
 0x117   :  { %727 = vst.msk [vmem:[%s1581_s3 + $0x1e8] sm:$0xff] %vm665_vm1, %v652_v56  ;;  %694 = vst.msk [vmem:[%s1581_s3 + $0xe0] sm:$0xff] %vm665_vm1, %v487_v59  ;;  %v916_v61 = vpop.f32.mrb[30].mxu0 }
 0x118   :  { %726 = vst.msk [vmem:[%s1581_s3 + $0x1e0] sm:$0xff] %vm665_vm1, %v647_v60  ;;  %v964_v62 = vpop.f32.mrb[30].mxu1  ;;  %v502_v63 = vadd.f32 %v916_v61, %v1256_v3  ;;  %v496_v1 = vpop.f32.mrb[31].mxu0 }
 0x119   :  { %v662_v0 = vadd.f32 %v964_v62, %v1256_v3  ;;  %v656_v2 = vpop.f32.mrb[31].mxu1  ;;  %v497_v4 = vadd.f32 %v1256_v3, %v496_v1 }
 0x11a   :  { %v657_v5 = vadd.f32 %v1256_v3, %v656_v2  ;;  %697 = vst.msk [vmem:[%s1581_s3 + $0xf8] sm:$0xff] %vm665_vm1, %v502_v63 }
 0x11b   :  { %729 = vst.msk [vmem:[%s1581_s3 + $0x1f8] sm:$0xff] %vm665_vm1, %v662_v0  ;;  %696 = vst.msk [vmem:[%s1581_s3 + $0xf0] sm:$0xff] %vm665_vm1, %v497_v4 }
 0x11c   :  { %728 = vst.msk [vmem:[%s1581_s3 + $0x1f0] sm:$0xff] %vm665_vm1, %v657_v5 }

</bundles_post_ra>
